<compile_context>
chip_gen: v7x
topology: tpu7x:2x2x1
jax: 0.10.0
libtpu: 0.0.40
codegen_flags: <defaults>
</compile_context>

<pallas_src>
import functools

import jax
import jax.numpy as jnp
from jax.experimental import pallas as pl
from jax.experimental.pallas import tpu as pltpu

_LANES = 128
_MAX_BLOCK_ROWS = 1024   # (1024, 128) f32 block = 512 KiB per input buffer
_ROW_ALIGN = 32          # sublane-tile safe for f32 / bf16 / int8 blocks


def _round_up(x, m):
    return (x + m - 1) // m * m


def _iou_sums_kernel(x_ref, t_ref, inter_ref, total_ref,
                     inter_acc, total_acc, *, n_valid, needs_mask):
    """Accumulates sum(sigmoid(x) * t) and sum(sigmoid(x) + t) per split."""
    step = pl.program_id(1)

    @pl.when(step == 0)
    def _():
        inter_acc[...] = jnp.zeros_like(inter_acc)
        total_acc[...] = jnp.zeros_like(total_acc)

    x = x_ref[...].astype(jnp.float32)
    t = t_ref[...].astype(jnp.float32)
    p = jax.nn.sigmoid(x)

    if needs_mask:
        # Zero-padded targets already contribute 0 to both sums; only the
        # sigmoid(0) == 0.5 of padded logits must be masked out.
        rows, lanes = x.shape
        block_elems = rows * lanes
        global_block = pl.program_id(0) * pl.num_programs(1) + step
        base = global_block * block_elems
        row_ids = jax.lax.broadcasted_iota(jnp.int32, (rows, lanes), 0)
        lane_ids = jax.lax.broadcasted_iota(jnp.int32, (rows, lanes), 1)
        gidx = base + row_ids * lanes + lane_ids
        p = jnp.where(gidx < n_valid, p, 0.0)

    # Elementwise (VPU-only) accumulation into block-shaped f32 scratch.
    inter_acc[...] += p * t
    total_acc[...] += p + t

    @pl.when(step == pl.num_programs(1) - 1)
    def _():
        inter_ref[...] = jnp.sum(inter_acc[...], keepdims=True)
        total_ref[...] = jnp.sum(total_acc[...], keepdims=True)


def _reduce_sums(x, t):
    """Returns (sum(sigmoid(x) * t), sum(sigmoid(x) + t)) as f32 scalars."""
    n = x.size
    rows_needed = (n + _LANES - 1) // _LANES
    block_rows = min(_MAX_BLOCK_ROWS, _round_up(rows_needed, _ROW_ALIGN))
    # Split work across 2 TensorCores (v7x) only when there is >1 block of it.
    num_splits = 2 if rows_needed > block_rows else 1
    rows_total = _round_up(rows_needed, num_splits * block_rows)
    blocks_per_split = rows_total // (num_splits * block_rows)
    pad = rows_total * _LANES - n

    def _prep(a):
        flat = a.reshape(-1)
        if pad:
            flat = jnp.pad(flat, (0, pad))   # zero padding; tail masked in-kernel
        return flat.reshape(rows_total, _LANES)

    xf = _prep(x)
    tf = _prep(t)

    kernel = functools.partial(_iou_sums_kernel, n_valid=n, needs_mask=pad > 0)
    in_map = lambda s, i: (s * blocks_per_split + i, 0)
    out_map = lambda s, i: (s, 0)

    inter, total = pl.pallas_call(
        kernel,
        out_shape=(
            jax.ShapeDtypeStruct((num_splits, 1), jnp.float32),
            jax.ShapeDtypeStruct((num_splits, 1), jnp.float32),
        ),
        grid_spec=pltpu.PrefetchScalarGridSpec(
            num_scalar_prefetch=0,
            grid=(num_splits, blocks_per_split),
            in_specs=[
                pl.BlockSpec((block_rows, _LANES), in_map),
                pl.BlockSpec((block_rows, _LANES), in_map),
            ],
            out_specs=[
                pl.BlockSpec((1, 1), out_map),
                pl.BlockSpec((1, 1), out_map),
            ],
            scratch_shapes=[
                pltpu.VMEM((block_rows, _LANES), jnp.float32),
                pltpu.VMEM((block_rows, _LANES), jnp.float32),
            ],
        ),
        compiler_params=pltpu.CompilerParams(
            dimension_semantics=("parallel", "arbitrary"),
        ),
    )(xf, tf)
    return jnp.sum(inter), jnp.sum(total)


@functools.partial(jax.jit, static_argnames=("smooth",))
def iou_loss(inputs, targets, smooth=1.0):
    if inputs.shape[1] > 1:
        # torch.nn.functional.one_hot(...).float(): new trailing class axis.
        # bf16 represents 0/1 exactly; halves HBM traffic vs an f32 one-hot.
        targets = jax.nn.one_hot(targets, inputs.shape[1], dtype=jnp.bfloat16)
    # PyTorch-style broadcasting of inputs vs. (possibly one-hot) targets.
    # No copy is materialized when the shapes already match (both demo cases).
    x, t = jnp.broadcast_arrays(inputs, targets)

    intersection, total = _reduce_sums(x, t)
    union = total - intersection
    iou = (intersection + smooth) / (union + smooth)
    return 1.0 - iou


def _iou_loss_ref(inputs, targets, smooth=1.0):
    """Pure-JAX reference mirroring the PyTorch forward."""
    p = jax.nn.sigmoid(inputs.astype(jnp.float32))
    if inputs.shape[1] > 1:
        targets = jax.nn.one_hot(targets, inputs.shape[1], dtype=jnp.float32)
    else:
        targets = targets.astype(jnp.float32)
    intersection = jnp.sum(p * targets)
    total = jnp.sum(p + targets)
    union = total - intersection
    return 1.0 - (intersection + smooth) / (union + smooth)


if __name__ == "__main__":
    key = jax.random.PRNGKey(0)
    k1, k2, k3, k4 = jax.random.split(key, 4)

    # Case 1: binary segmentation (C == 1), targets are a float {0,1} mask.
    logits_bin = jax.random.normal(k1, (2, 1, 16, 16), dtype=jnp.float32)
    mask_bin = (jax.random.uniform(k2, (2, 1, 16, 16)) > 0.5).astype(jnp.float32)
    loss_bin = iou_loss(logits_bin, mask_bin)
    jax.block_until_ready(loss_bin)
    ref_bin = _iou_loss_ref(logits_bin, mask_bin)
    assert jnp.allclose(loss_bin, ref_bin, atol=1e-5, rtol=1e-5), (loss_bin, ref_bin)

    # Case 2: multi-class branch (C > 1) with integer class targets, shapes for
    # which the reference module's broadcasting is actually well-defined.
    logits_mc = jax.random.normal(k3, (8, 4), dtype=jnp.float32)
    targets_mc = jax.random.randint(k4, (8,), 0, 4)
    loss_mc = iou_loss(logits_mc, targets_mc)
    jax.block_until_ready(loss_mc)
    ref_mc = _iou_loss_ref(logits_mc, targets_mc)
    assert jnp.allclose(loss_mc, ref_mc, atol=1e-5, rtol=1e-5), (loss_mc, ref_mc)

    print("KERNEL_OK")
</pallas_src>

<mosaic_0001>
module attributes {stable_mosaic.version = 11 : i64} {
  func.func @_iou_sums_kernel(%arg0: i32, %arg1: i32, %arg2: memref<32x128xf32, #tpu.memory_space<vmem>>, %arg3: memref<32x128xf32, #tpu.memory_space<vmem>>, %arg4: memref<1x1xf32, #tpu.memory_space<vmem>>, %arg5: memref<1x1xf32, #tpu.memory_space<vmem>>, %arg6: memref<32x128xf32, #tpu.memory_space<vmem>>, %arg7: memref<32x128xf32, #tpu.memory_space<vmem>>) attributes {dimension_semantics = [#tpu.dimension_semantics<parallel>, #tpu.dimension_semantics<arbitrary>], iteration_bounds = array<i64: 1, 1>, scalar_prefetch = 0 : i64, scratch_operands = 2 : i64, tpu.core_type = #tpu.core_type<tc>, window_params = [{transform_indices = @transform_0, window_bounds = array<i64: 32, 128>}, {transform_indices = @transform_1, window_bounds = array<i64: 32, 128>}, {transform_indices = @transform_2, window_bounds = array<i64: 1, 1>}, {transform_indices = @transform_3, window_bounds = array<i64: 1, 1>}]} {
    %c0_i32 = arith.constant 0 : i32
    %0 = arith.cmpi eq, %arg1, %c0_i32 : i32
    %1 = arith.extui %0 : i1 to i32
    %c0_i32_0 = arith.constant 0 : i32
    %2 = arith.cmpi ne, %1, %c0_i32_0 : i32
    scf.if %2 {
      %cst_15 = arith.constant 0.000000e+00 : f32
      %35 = vector.broadcast %cst_15 : f32 to vector<32x128xf32>
      %c0_16 = arith.constant 0 : index
      %c0_17 = arith.constant 0 : index
      %36 = vector.load %arg6[%c0_16, %c0_17] : memref<32x128xf32, #tpu.memory_space<vmem>>, vector<32x128xf32>
      tpu.vector_store %arg6[%c0_16, %c0_17], %35 {strides = array<i32>} : memref<32x128xf32, #tpu.memory_space<vmem>>, vector<32x128xf32>,
      %cst_18 = arith.constant 0.000000e+00 : f32
      %37 = vector.broadcast %cst_18 : f32 to vector<32x128xf32>
      %c0_19 = arith.constant 0 : index
      %c0_20 = arith.constant 0 : index
      %38 = vector.load %arg7[%c0_19, %c0_20] : memref<32x128xf32, #tpu.memory_space<vmem>>, vector<32x128xf32>
      tpu.vector_store %arg7[%c0_19, %c0_20], %37 {strides = array<i32>} : memref<32x128xf32, #tpu.memory_space<vmem>>, vector<32x128xf32>,
    } else {
    }
    %c0 = arith.constant 0 : index
    %c0_1 = arith.constant 0 : index
    %3 = vector.load %arg2[%c0, %c0_1] : memref<32x128xf32, #tpu.memory_space<vmem>>, vector<32x128xf32>
    %c0_2 = arith.constant 0 : index
    %c0_3 = arith.constant 0 : index
    %4 = vector.load %arg3[%c0_2, %c0_3] : memref<32x128xf32, #tpu.memory_space<vmem>>, vector<32x128xf32>
    %5 = arith.negf %3 : vector<32x128xf32>
    %6 = math.exp %5 : vector<32x128xf32>
    %cst = arith.constant 1.000000e+00 : f32
    %7 = vector.broadcast %cst : f32 to vector<32x128xf32>
    %8 = arith.addf %7, %6 : vector<32x128xf32>
    %9 = arith.divf %7, %8 : vector<32x128xf32>
    %c1_i32 = arith.constant 1 : i32
    %10 = arith.muli %arg0, %c1_i32 : i32
    %11 = arith.addi %10, %arg1 : i32
    %c4096_i32 = arith.constant 4096 : i32
    %12 = arith.muli %11, %c4096_i32 : i32
    %13 = tpu.iota {dimensions = array<i32: 0>} : vector<32x128xi32>
    %14 = tpu.iota {dimensions = array<i32: 1>} : vector<32x128xi32>
    %c128_i32 = arith.constant 128 : i32
    %15 = vector.broadcast %c128_i32 : i32 to vector<32x128xi32>
    %16 = arith.muli %13, %15 : vector<32x128xi32>
    %17 = vector.broadcast %12 : i32 to vector<32x128xi32>
    %18 = arith.addi %17, %16 : vector<32x128xi32>
    %19 = arith.addi %18, %14 : vector<32x128xi32>
    %c512_i32 = arith.constant 512 : i32
    %20 = vector.broadcast %c512_i32 : i32 to vector<32x128xi32>
    %21 = arith.cmpi slt, %19, %20 : vector<32x128xi32>
    %cst_4 = arith.constant 0.000000e+00 : f32
    %22 = vector.broadcast %cst_4 : f32 to vector<32x128xf32>
    %23 = arith.select %21, %9, %22 : vector<32x128xi1>, vector<32x128xf32>
    %c0_5 = arith.constant 0 : index
    %c0_6 = arith.constant 0 : index
    %24 = vector.load %arg6[%c0_5, %c0_6] : memref<32x128xf32, #tpu.memory_space<vmem>>, vector<32x128xf32>
    %25 = arith.mulf %23, %4 : vector<32x128xf32>
    %26 = arith.addf %24, %25 : vector<32x128xf32>
    %c0_7 = arith.constant 0 : index
    %c0_8 = arith.constant 0 : index
    %27 = vector.load %arg6[%c0_7, %c0_8] : memref<32x128xf32, #tpu.memory_space<vmem>>, vector<32x128xf32>
    tpu.vector_store %arg6[%c0_7, %c0_8], %26 {strides = array<i32>} : memref<32x128xf32, #tpu.memory_space<vmem>>, vector<32x128xf32>,
    %c0_9 = arith.constant 0 : index
    %c0_10 = arith.constant 0 : index
    %28 = vector.load %arg7[%c0_9, %c0_10] : memref<32x128xf32, #tpu.memory_space<vmem>>, vector<32x128xf32>
    %29 = arith.addf %23, %4 : vector<32x128xf32>
    %30 = arith.addf %28, %29 : vector<32x128xf32>
    %c0_11 = arith.constant 0 : index
    %c0_12 = arith.constant 0 : index
    %31 = vector.load %arg7[%c0_11, %c0_12] : memref<32x128xf32, #tpu.memory_space<vmem>>, vector<32x128xf32>
    tpu.vector_store %arg7[%c0_11, %c0_12], %30 {strides = array<i32>} : memref<32x128xf32, #tpu.memory_space<vmem>>, vector<32x128xf32>,
    %c0_i32_13 = arith.constant 0 : i32
    %32 = arith.cmpi eq, %arg1, %c0_i32_13 : i32
    %33 = arith.extui %32 : i1 to i32
    %c0_i32_14 = arith.constant 0 : i32
    %34 = arith.cmpi ne, %33, %c0_i32_14 : i32
    scf.if %34 {
      %c0_15 = arith.constant 0 : index
      %c0_16 = arith.constant 0 : index
      %35 = vector.load %arg6[%c0_15, %c0_16] : memref<32x128xf32, #tpu.memory_space<vmem>>, vector<32x128xf32>
      %36 = vector.shape_cast %35 : vector<32x128xf32> to vector<1x32x128xf32>
      %cst_17 = arith.constant dense<0.000000e+00> : vector<1xf32>
      %37 = vector.multi_reduction <add>, %36, %cst_17 [1, 2] : vector<1x32x128xf32> to vector<1xf32>
      %38 = vector.shape_cast %37 : vector<1xf32> to vector<1x1x1xf32>
      %39 = vector.extract %38[0, 0, 0] : f32 from vector<1x1x1xf32>
      %40 = vector.broadcast %39 : f32 to vector<1x1xf32>
      %c0_18 = arith.constant 0 : index
      %c0_19 = arith.constant 0 : index
      %41 = vector.load %arg4[%c0_18, %c0_19] : memref<1x1xf32, #tpu.memory_space<vmem>>, vector<1x1xf32>
      tpu.vector_store %arg4[%c0_18, %c0_19], %40 {strides = array<i32>} : memref<1x1xf32, #tpu.memory_space<vmem>>, vector<1x1xf32>,
      %c0_20 = arith.constant 0 : index
      %c0_21 = arith.constant 0 : index
      %42 = vector.load %arg7[%c0_20, %c0_21] : memref<32x128xf32, #tpu.memory_space<vmem>>, vector<32x128xf32>
      %43 = vector.shape_cast %42 : vector<32x128xf32> to vector<1x32x128xf32>
      %cst_22 = arith.constant dense<0.000000e+00> : vector<1xf32>
      %44 = vector.multi_reduction <add>, %43, %cst_22 [1, 2] : vector<1x32x128xf32> to vector<1xf32>
      %45 = vector.shape_cast %44 : vector<1xf32> to vector<1x1x1xf32>
      %46 = vector.extract %45[0, 0, 0] : f32 from vector<1x1x1xf32>
      %47 = vector.broadcast %46 : f32 to vector<1x1xf32>
      %c0_23 = arith.constant 0 : index
      %c0_24 = arith.constant 0 : index
      %48 = vector.load %arg5[%c0_23, %c0_24] : memref<1x1xf32, #tpu.memory_space<vmem>>, vector<1x1xf32>
      tpu.vector_store %arg5[%c0_23, %c0_24], %47 {strides = array<i32>} : memref<1x1xf32, #tpu.memory_space<vmem>>, vector<1x1xf32>,
    } else {
    }
    return
  }
  func.func @transform_0(%arg0: i32, %arg1: i32) -> (i32, i32) {
    %c1_i32 = arith.constant 1 : i32
    %0 = arith.muli %arg0, %c1_i32 : i32
    %1 = arith.addi %0, %arg1 : i32
    %c0_i32 = arith.constant 0 : i32
    %c0_i32_0 = arith.constant 0 : i32
    return %1, %c0_i32 : i32, i32
  }
  func.func @transform_1(%arg0: i32, %arg1: i32) -> (i32, i32) {
    %c1_i32 = arith.constant 1 : i32
    %0 = arith.muli %arg0, %c1_i32 : i32
    %1 = arith.addi %0, %arg1 : i32
    %c0_i32 = arith.constant 0 : i32
    %c0_i32_0 = arith.constant 0 : i32
    return %1, %c0_i32 : i32, i32
  }
  func.func @transform_2(%arg0: i32, %arg1: i32) -> (i32, i32) {
    %c0_i32 = arith.constant 0 : i32
    %c0_i32_0 = arith.constant 0 : i32
    return %arg0, %c0_i32 : i32, i32
  }
  func.func @transform_3(%arg0: i32, %arg1: i32) -> (i32, i32) {
    %c0_i32 = arith.constant 0 : i32
    %c0_i32_0 = arith.constant 0 : i32
    return %arg0, %c0_i32 : i32, i32
  }
}

</mosaic_0001>

<bundles_post_ra>
// kernel: iou_loss.1
= control target key start
LH: loop header
LB: loop body
LE: loop exit
PB: predicated region body
PF: predicated region fallthrough
CT: control target
= control target key end

     0   :  { %9 = vsyncpa [#allocation5], 0  ;;  %s391_s0 = inlined_call_operand.vmem [shape: f32[32,128], index: 0, kind: input, shape index: {}]   ;;  %s392_s1 = inlined_call_operand.vmem [shape: f32[32,128], index: 1, kind: input, shape index: {}]   ;;  %s393_s2 = inlined_call_operand.hbm [shape: f32[1,1], index: 2, kind: output, shape index: {0}]   ;;  %s394_s3 = inlined_call_operand.hbm [shape: f32[1,1], index: 3, kind: output, shape index: {1}]  }
   0x1   :  { %v71_v0 = vld [vmem:[%s391_s0] sm:$0xff]  ;;  %v72_v1 = vld [vmem:[%s391_s0 + $0x8] sm:$0xff]  ;;  %v73_v2 = vld [vmem:[%s391_s0 + $0x10] sm:$0xff] }
   0x2   :  { %v74_v3 = vld [vmem:[%s391_s0 + $0x18] sm:$0xff]  ;;  %v245_v4 = vmul.f32 -1.442695, %v71_v0  ;;  %v246_v5 = vmul.f32 -1.442695, %v72_v1 }
   0x3   :  { %v247_v6 = vmul.f32 -1.442695, %v73_v2  ;;  %v248_v7 = vmul.f32 -1.442695, %v74_v3 }
   0x4   :  { %255 = vpow2.f32 %v245_v4 }
   0x5   :  { %10 = vsyncpa [#allocation7], 0  ;;  %257 = vpow2.f32 %v246_v5  ;;  %v105_v8 = vlaneseq  ;;  %v75_v30 = vld [vmem:[%s392_s1] sm:$0xff]  ;;  %v76_v32 = vld [vmem:[%s392_s1 + $0x8] sm:$0xff]  ;;  %vm185_vm4 = vcmask 0   ;;  %s320_s29 = smov [#allocation6]  }
   0x6   :  { %259 = vpow2.f32 %v247_v6  ;;  %v77_v34 = vld [vmem:[%s392_s1 + $0x10] sm:$0xff]  ;;  %v78_v37 = vld [vmem:[%s392_s1 + $0x18] sm:$0xff]  ;;  %s319_s1 = smov [#allocation4]   ;;  %s221_s30 = sshll.u32 %s320_s29, 4  ;;  %s222_s30 = int_to_ptr.vmem [resolvable:$true] %s221_s30 }
   0x7   :  { %261 = vpow2.f32 %v248_v7  ;;  %v106_v9 = vshrl.u32 %v105_v8, 7  ;;  %v111_v20 = vand.u32 127, %v105_v8  ;;  %s211_s27 = sshll.u32 %s319_s1, 4  ;;  %s212_s27 = int_to_ptr.vmem [resolvable:$true] %s211_s27 }
   0x8   :  { %s271_s4 = scalar_lea.vmem %s212_s27, 16  ;;  %s275_s5 = scalar_lea.vmem %s212_s27, 32 }
   0x9   :  { %v107_v11 = vadd.s32 8, %v106_v9  ;;  %v108_v14 = vadd.s32 16, %v106_v9  ;;  %v109_v17 = vadd.s32 24, %v106_v9  ;;  %v112_v21 = vmul.u32 128, %v106_v9  ;;  %p272_p0 = scmp.ne.s32.totalorder %s212_s27, %s271_s4  ;;  %p276_p1 = scmp.lt.s32.totalorder %s212_s27, %s212_s27 }
   0xa   :  { %p277_p2 = scmp.lt.s32.totalorder %s275_s5, %s271_s4 }
   0xb   :  { %v113_v23 = vmul.u32 128, %v107_v11  ;;  %v114_v24 = vmul.u32 128, %v108_v14  ;;  %v121_v26 = vadd.s32 %v112_v21, %v111_v20 }
   0xc   :  { %v115_v25 = vmul.u32 128, %v109_v17  ;;  %p278_p3 = por %p277_p2, %p276_p1 }
   0xd   :  { %v122_v27 = vadd.s32 %v113_v23, %v111_v20  ;;  %v123_v28 = vadd.s32 %v114_v24, %v111_v20  ;;  %vm125_vm0 = vcmp.lt.s32.totalorder %v121_v26, 512 }
   0xe   :  { %v256_v10 = vpop.eup %255  ;;  %v124_v29 = vadd.s32 %v115_v25, %v111_v20  ;;  %p279_p4 = pnand %p278_p3, %p272_p0 }
   0xf   :  { %v258_v12 = vpop.eup %257  ;;  %v91_v13 = vadd.f32 1.0, %v256_v10  ;;  %vm126_vm1 = vcmp.lt.s32.totalorder %v122_v27, 512  ;;  %vm127_vm2 = vcmp.lt.s32.totalorder %v123_v28, 512 }
  0x10   :  { %v260_v15 = vpop.eup %259  ;;  %v92_v16 = vadd.f32 1.0, %v258_v12  ;;  %vm128_vm3 = vcmp.lt.s32.totalorder %v124_v29, 512 }
  0x11   :  { %v262_v18 = vpop.eup %261  ;;  %v93_v19 = vadd.f32 1.0, %v260_v15  ;;  %263 = vrcp.f32 %v91_v13 }
  0x12   :  { %v94_v22 = vadd.f32 1.0, %v262_v18  ;;  %265 = vrcp.f32 %v92_v16 }
  0x13   :  { %267 = vrcp.f32 %v93_v19 }
  0x14   :  { %269 = vrcp.f32 %v94_v22 }
  0x1b   :  { %v264_v31 = vpop.eup %263 }
  0x1c   :  { %v266_v33 = vpop.eup %265  ;;  %v129_v35 = vsel %vm125_vm0, %v264_v31, 0.0 }
  0x1d   :  { %v268_v36 = vpop.eup %267  ;;  %v130_v38 = vsel %vm126_vm1, %v266_v33, 0.0  ;;  %v137_v39 = vmul.f32 %v129_v35, %v75_v30  ;;  %v153_v40 = vadd.f32 %v129_v35, %v75_v30 }
  0x1e   :  { %v270_v41 = vpop.eup %269  ;;  %v131_v42 = vsel %vm127_vm2, %v268_v36, 0.0  ;;  %v138_v43 = vmul.f32 %v130_v38, %v76_v32  ;;  %v154_v44 = vadd.f32 %v130_v38, %v76_v32 }
  0x1f   :  { %v132_v45 = vsel %vm128_vm3, %v270_v41, 0.0  ;;  %v139_v46 = vmul.f32 %v131_v42, %v77_v34  ;;  %v155_v47 = vadd.f32 %v131_v42, %v77_v34 }
  0x20   :  { %v140_v48 = vmul.f32 %v132_v45, %v78_v37  ;;  %v172_v49 = vadd.f32 %v138_v43, %v137_v39  ;;  %v191_v50 = vadd.f32 %v154_v44, %v153_v40  ;;  %v156_v52 = vadd.f32 %v132_v45, %v78_v37 }
  0x22   :  { %v173_v51 = vadd.f32 %v172_v49, %v139_v46  ;;  %v192_v53 = vadd.f32 %v191_v50, %v155_v47 }
  0x24   :  { %v174_v54 = vadd.f32 %v173_v51, %v140_v48  ;;  %v193_v55 = vadd.f32 %v192_v53, %v156_v52 }
  0x26   :  { %175 = vadd.xlane.f32.xlu0 %v174_v54 }
  0x2a   :  { %194 = vadd.xlane.f32.xlu0 %v193_v55 }
  0xb3   :  { %v176_v56 = vpop.xlane.xlu0 %175 }
  0xb4   :  { %v177_v57 = vrot.slane %v176_v56, 4 }
  0xb6   :  { %v178_v58 = vadd.f32 %v177_v57, %v176_v56 }
  0xb7   :  { %v195_v59 = vpop.xlane.xlu0 %194 }
  0xb8   :  { %v179_v60 = vrot.slane %v178_v58, 2  ;;  %v196_v61 = vrot.slane %v195_v59, 4 }
  0xba   :  { %v197_v62 = vadd.f32 %v196_v61, %v195_v59  ;;  %v180_v63 = vadd.f32 %v179_v60, %v178_v58 }
  0xbc   :  { %v198_v0 = vrot.slane %v197_v62, 2  ;;  %v181_v1 = vrot.slane %v180_v63, 1 }
  0xbe   :  { %v199_v2 = vadd.f32 %v198_v0, %v197_v62  ;;  %v182_v3 = vadd.f32 %v181_v1, %v180_v63 }
  0xc0   :  { %249 = vpush %v182_v3  ;;  %v200_v4 = vrot.slane %v199_v2, 1 }
  0xc2   :  { %v201_v5 = vadd.f32 %v200_v4, %v199_v2 }
  0xc4   :  { %251 = vpush %v201_v5 }
  0xf1   :  { %s250_s28 = spop %249 }
  0xf2   :  { %v184_v6 = vstv %s250_s28 }
  0xf3   :  { %186 = vst.msk [vmem:[#allocation4] sm:$0x1] %vm185_vm4, %v184_v6 }
  0xf4   :  { %282 = shalt.err (!%p279_p4)
}
  0xf5   :  { %s283_s8 = scalar_lea.hbm %s393_s2, 16 }
  0xf6   :  { %p284_p5 = scmp.ne.s32.totalorder %s393_s2, %s283_s8  ;;  %p287_p6 = scmp.lt.u32.totalorder %s283_s8, %s393_s2 }
  0xf8   :  { %p289_p7 = pnand %p287_p6, %p284_p5 }
  0xfa   :  { %292 = shalt.err (!%p289_p7)
}
  0xfb   :  { %214 = dma.vmem_to_hbm [thread:$0]  %s212_s27, 16, %s393_s2, [#allocation5]  }
  0xfc   :  { %s252_s15 = spop %251  ;;  %s293_s16 = scalar_lea.vmem %s222_s30, 16 }
  0xfd   :  { %v203_v7 = vstv %s252_s15  ;;  %p294_p8 = scmp.ne.s32.totalorder %s222_s30, %s293_s16  ;;  %s297_s17 = scalar_lea.vmem %s222_s30, 32 }
  0xfe   :  { %204 = vst.msk [vmem:[#allocation6] sm:$0x1] %vm185_vm4, %v203_v7  ;;  %p298_p9 = scmp.lt.s32.totalorder %s222_s30, %s222_s30  ;;  %p299_p10 = scmp.lt.s32.totalorder %s297_s17, %s293_s16 }
 0x100   :  { %p300_p11 = por %p299_p10, %p298_p9 }
 0x102   :  { %p301_p12 = pnand %p300_p11, %p294_p8 }
 0x104   :  { %304 = shalt.err (!%p301_p12)
}
 0x105   :  { %s305_s0 = scalar_lea.hbm %s394_s3, 16 }
 0x106   :  { %p306_p13 = scmp.ne.s32.totalorder %s394_s3, %s305_s0  ;;  %p309_p0 = scmp.lt.u32.totalorder %s305_s0, %s394_s3 }
 0x108   :  { %p311_p1 = pnand %p309_p0, %p306_p13 }
 0x10a   :  { %314 = shalt.err (!%p311_p1)
}
 0x10b   :  { %224 = dma.vmem_to_hbm [thread:$0]  %s222_s30, 16, %s394_s3, [#allocation7]  }
 0x10c   :  { %315 = dma.done.wait [#allocation5], 16  }
 0x10d   :  { %316 = vsyncadd [#allocation5], 4294967280 }
 0x10e   :  { %317 = dma.done.wait [#allocation7], 16  }
 0x10f   :  { %318 = vsyncadd [#allocation7], 4294967280 }
 0x110   :  { %231 = vsyncpa [#allocation5], 1 }
 0x111   :  { %232 = vsyncpa [#allocation7], 1 }

</bundles_post_ra>
